<compile_context>
chip_gen: v7x
topology: tpu7x:2x2x1
jax: 0.10.0
libtpu: 0.0.40
codegen_flags: <defaults>
</compile_context>

<pallas_src>
import functools
import math

import jax
import jax.numpy as jnp
import numpy as np
from jax import lax
from jax.experimental import pallas as pl
from jax.experimental.pallas import tpu as pltpu


def _round_up(a: int, b: int) -> int:
    return (a + b - 1) // b * b


def _vmem_limit_bytes(want: int = 96 * 1024 * 1024) -> int:
    """96 MiB on v5e/v6e (128 MiB physical), auto-capped to 3/4 VMEM on v7x."""
    cap = 128 * 1024 * 1024
    try:
        cap = int(getattr(pltpu.get_tpu_info(), "vmem_capacity_bytes", cap))
    except Exception:
        pass
    return int(min(want, cap * 3 // 4))


# ---------------------------------------------------------------------------
# Kernel 1: fused node-wise projections  qkv = x @ [Wq|Wk|Wv] + [bq|bk|bv],
# split into q/k/v outputs.  Tiled over node tiles ("parallel").
# ---------------------------------------------------------------------------
def _proj_kernel(x_ref, w_ref, b_ref, q_ref, k_ref, v_ref):
    d = q_ref.shape[-1]
    y = jnp.dot(x_ref[...], w_ref[...],
                preferred_element_type=jnp.float32) + b_ref[...]
    q_ref[...] = y[:, 0 * d:1 * d]
    k_ref[...] = y[:, 1 * d:2 * d]
    v_ref[...] = y[:, 2 * d:3 * d]


# ---------------------------------------------------------------------------
# Kernel 2: edge phase.  grid = (2 phases, E tiles), accumulators + prods
# scratch persist across the whole grid.
#   phase 0: gather rows, prods via head-selector matmul, online max/sum.
#   phase 1: gather segment stats, normalize; write attn & prods outputs
#            (their last visit), prods copied from the VMEM scratch.
# ---------------------------------------------------------------------------
def _edge_kernel(src_ref, dst_ref, nrm_ref,              # scalar prefetch (SMEM)
                 q_ref, k_ref, ea_ref, hsel_ref,         # VMEM inputs
                 attn_ref, prods_ref,                    # outputs [tE, H]
                 rows_q, rows_k, prods_full, gmax_s, gsum_s, m_acc, s_acc,
                 *, reweight, unroll):
    p = pl.program_id(0)          # phase
    t = pl.program_id(1)          # edge tile
    tile_e, n_heads = attn_ref.shape
    base = pl.multiple_of(t * tile_e, tile_e)
    n_iter = tile_e // unroll

    # ---- init shared segment accumulators on the very first grid step ----
    @pl.when(jnp.logical_and(p == 0, t == 0))
    def _init():
        m_acc[...] = jnp.full_like(m_acc, -1e30)
        s_acc[...] = jnp.zeros_like(s_acc)

    # ---------------- phase 0: prods + online segment softmax stats -------
    @pl.when(p == 0)
    def _phase0():
        # Index-based gather of q[src[e]] / k[dst[e]] rows (unrolled x8).
        def gather_body(i, carry):
            e0 = i * unroll
            for u in range(unroll):
                e = e0 + u
                rs = src_ref[base + e]
                rd = dst_ref[base + e]
                rows_q[pl.ds(e, 1), :] = q_ref[pl.ds(rs, 1), :]
                rows_k[pl.ds(e, 1), :] = k_ref[pl.ds(rd, 1), :]
            return carry
        lax.fori_loop(0, n_iter, gather_body, 0)

        # Per-head scaled dot product: (q*k) @ head_selector  (MXU, scale
        # folded into the selector; selector is lane-padded to 128 cols).
        sd = rows_q[...] * rows_k[...]                                   # [tE, D]
        pt = jnp.dot(sd, hsel_ref[...],
                     preferred_element_type=jnp.float32)[:, :n_heads]   # [tE, H]
        if reweight:
            pt = pt * ea_ref[...]                                        # [tE,1] bcast
        prods_full[pl.ds(base, tile_e), :] = pt     # computed exactly once

        # Online-softmax scatter: m_new = max(m, p);
        # s = s * exp(m - m_new) + exp(p - m_new);  m = m_new.   (unrolled)
        def stat_body(i, carry):
            e0 = i * unroll
            for u in range(unroll):
                e = e0 + u
                r = nrm_ref[base + e]
                p_row = prods_full[pl.ds(base + e, 1), :]
                m_old = m_acc[pl.ds(r, 1), :]
                m_new = jnp.maximum(m_old, p_row)
                s_acc[pl.ds(r, 1), :] = (s_acc[pl.ds(r, 1), :] * jnp.exp(m_old - m_new)
                                         + jnp.exp(p_row - m_new))
                m_acc[pl.ds(r, 1), :] = m_new
            return carry
        lax.fori_loop(0, n_iter, stat_body, 0)

    # ---------------- phase 1: normalize and emit outputs -----------------
    # (outputs are only written here, on the block's last visit; the garbage
    #  writeback from phase 0 is overwritten by this sequential grid step.)
    @pl.when(p == 1)
    def _phase1():
        def gat_body(i, carry):
            e0 = i * unroll
            for u in range(unroll):
                e = e0 + u
                r = nrm_ref[base + e]
                gmax_s[pl.ds(e, 1), :] = m_acc[pl.ds(r, 1), :]
                gsum_s[pl.ds(e, 1), :] = s_acc[pl.ds(r, 1), :]
            return carry
        lax.fori_loop(0, n_iter, gat_body, 0)

        pt = prods_full[pl.ds(base, tile_e), :]
        prods_ref[...] = pt
        attn_ref[...] = jnp.exp(pt - gmax_s[...]) / (gsum_s[...] + 1e-16)


# ---------------------------------------------------------------------------
# Wrapper
# ---------------------------------------------------------------------------
def sparse_graph_transformer_attention(x, edge, params, opt, edge_attr=None,
                                       *, tile_n=512, tile_e=256, unroll=8):
    """Returns (attention [E,H], (v [N,d_head,H], prods [E,H])) like the torch module."""
    N, F = x.shape
    H = int(opt['n_heads'])
    D = params['wq'].shape[1]
    assert D % H == 0
    Dh = D // H
    E = edge.shape[1]

    assert opt['attention_type'] == 'scaled_dot'
    assert not opt.get('square_plus', False)  # TODO(synk): squareplus branch not implemented
    norm_idx = int(opt['attention_norm_idx'])
    reweight = bool(opt['reweight_attention']) and (edge_attr is not None)

    # ---- tiling / padding plan ----
    tile_n = min(tile_n, _round_up(N, 8))
    tile_e = min(tile_e, _round_up(E, 8))
    assert tile_n % 8 == 0 and tile_e % 8 == 0
    unroll = math.gcd(int(unroll), tile_e)
    N_pad = _round_up(N, tile_n)
    E_pad = _round_up(E, tile_e)
    N_acc = _round_up(N + 1, 8)          # extra dummy segment row for padded edges

    f32 = jnp.float32
    vmem_limit = _vmem_limit_bytes()
    x_p = jnp.zeros((N_pad, F), f32).at[:N].set(x.astype(f32))

    # ---- kernel 1: fused q/k/v projections (parallel over node tiles) ----
    w_qkv = jnp.concatenate([params['wq'], params['wk'], params['wv']],
                            axis=1).astype(f32)                        # [F, 3D]
    b_qkv = jnp.concatenate([params['bq'].reshape(1, D),
                             params['bk'].reshape(1, D),
                             params['bv'].reshape(1, D)], axis=1).astype(f32)

    const2 = lambda i: (0, 0)
    q, k, v2d = pl.pallas_call(
        _proj_kernel,
        out_shape=(jax.ShapeDtypeStruct((N_pad, D), f32),) * 3,
        grid=(N_pad // tile_n,),
        in_specs=[pl.BlockSpec((tile_n, F), lambda i: (i, 0)),
                  pl.BlockSpec((F, 3 * D), const2),
                  pl.BlockSpec((1, 3 * D), const2)],
        out_specs=(pl.BlockSpec((tile_n, D), lambda i: (i, 0)),) * 3,
        compiler_params=pltpu.CompilerParams(
            dimension_semantics=("parallel",),
            vmem_limit_bytes=vmem_limit),
    )(x_p, w_qkv, b_qkv)

    # ---- kernel 2: edge phase (scalar-prefetch indices, (2, E-tiles) grid) ----
    # TODO(synk): for E beyond the SMEM budget, keep indices in HBM (pl.ANY)
    # and DMA per-tile slices instead of scalar-prefetching whole-E arrays.
    edge = edge.astype(jnp.int32)
    src_idx = jnp.zeros((E_pad,), jnp.int32).at[:E].set(edge[0])
    dst_idx = jnp.zeros((E_pad,), jnp.int32).at[:E].set(edge[1])
    # padded edges are routed to a dummy segment row so they never contaminate stats
    nrm_idx = jnp.full((E_pad,), N_acc - 1, jnp.int32).at[:E].set(edge[norm_idx])
    ea = edge_attr if edge_attr is not None else jnp.ones((E,), f32)
    ea_p = jnp.ones((E_pad, 1), f32).at[:E, 0].set(ea.astype(f32))

    # Head-selector matmul weight: hsel[d, h] = 1/sqrt(Dh) if d // Dh == h,
    # lane-padded to 128 output columns (extra columns are zero).
    HS = _round_up(H, 128)
    hsel = jnp.where((jnp.arange(D)[:, None] // Dh) == jnp.arange(HS)[None, :],
                     jnp.float32(1.0 / math.sqrt(Dh)), 0.0).astype(f32)

    kernel = functools.partial(_edge_kernel, reweight=reweight, unroll=unroll)

    attn_p, prods_p = pl.pallas_call(
        kernel,
        out_shape=(jax.ShapeDtypeStruct((E_pad, H), f32),
                   jax.ShapeDtypeStruct((E_pad, H), f32)),
        grid_spec=pltpu.PrefetchScalarGridSpec(
            num_scalar_prefetch=3,
            grid=(2, E_pad // tile_e),
            in_specs=[pl.BlockSpec((N_pad, D), lambda p, t, s, d, n: (0, 0)),
                      pl.BlockSpec((N_pad, D), lambda p, t, s, d, n: (0, 0)),
                      pl.BlockSpec((tile_e, 1), lambda p, t, s, d, n: (t, 0)),
                      pl.BlockSpec((D, HS), lambda p, t, s, d, n: (0, 0))],
            out_specs=(pl.BlockSpec((tile_e, H), lambda p, t, s, d, n: (t, 0)),
                       pl.BlockSpec((tile_e, H), lambda p, t, s, d, n: (t, 0))),
            scratch_shapes=[pltpu.VMEM((tile_e, D), f32),    # rows_q
                            pltpu.VMEM((tile_e, D), f32),    # rows_k
                            pltpu.VMEM((E_pad, H), f32),     # prods (written once, phase 0)
                            pltpu.VMEM((tile_e, H), f32),    # gmax gather
                            pltpu.VMEM((tile_e, H), f32),    # gsum gather
                            pltpu.VMEM((N_acc, H), f32),     # segment running max
                            pltpu.VMEM((N_acc, H), f32)]),   # segment running sum
        compiler_params=pltpu.CompilerParams(
            dimension_semantics=("arbitrary", "arbitrary"),
            vmem_limit_bytes=vmem_limit),
    )(src_idx, dst_idx, nrm_idx, q, k, ea_p, hsel)

    attn = attn_p[:E]
    prods = prods_p[:E]
    v = v2d[:N].reshape(N, H, Dh).transpose(0, 2, 1)   # [N, d_head, n_heads]
    return attn, (v, prods)


# ---------------------------------------------------------------------------
# Pure-JAX reference mirroring the torch forward (correctness check)
# ---------------------------------------------------------------------------
def _reference(x, edge, params, opt, edge_attr):
    N = x.shape[0]
    H = int(opt['n_heads'])
    D = params['wq'].shape[1]
    Dh = D // H
    q = (x @ params['wq'] + params['bq'].reshape(1, D)).reshape(N, H, Dh).transpose(0, 2, 1)
    k = (x @ params['wk'] + params['bk'].reshape(1, D)).reshape(N, H, Dh).transpose(0, 2, 1)
    v = (x @ params['wv'] + params['bv'].reshape(1, D)).reshape(N, H, Dh).transpose(0, 2, 1)
    src = q[edge[0]]
    dstk = k[edge[1]]
    prods = jnp.sum(src * dstk, axis=1) / math.sqrt(Dh)            # [E, H]
    if opt['reweight_attention'] and edge_attr is not None:
        prods = prods * edge_attr[:, None]
    idx = edge[int(opt['attention_norm_idx'])]
    seg_max = jax.ops.segment_max(prods, idx, num_segments=N)
    ev = jnp.exp(prods - seg_max[idx])
    seg_sum = jax.ops.segment_sum(ev, idx, num_segments=N)
    attn = ev / (seg_sum[idx] + 1e-16)
    return attn, (v, prods)


if __name__ == "__main__":
    # Small shapes consistent with the module: N nodes, F=in_features, D=d_attention.
    N, F, E = 12, 32, 20
    opt = dict(n_heads=4, leaky_relu_slope=0.2, d_hidden_attention=32,
               attention_type='scaled_dot', reweight_attention=True,
               square_plus=False, attention_norm_idx=1)
    D = int(opt['d_hidden_attention'])

    key = jax.random.PRNGKey(0)
    k1, k2, k3, k4, k5, k6 = jax.random.split(key, 6)
    x = jax.random.normal(k1, (N, F), jnp.float32)
    edge = jax.random.randint(k2, (2, E), 0, N)
    edge_attr = jax.random.uniform(k3, (E,), jnp.float32)

    # init_weights(): q/k/v weights constant 1e-5; biases deterministic uniform.
    bound = 1.0 / math.sqrt(F)
    params = dict(
        wq=jnp.full((F, D), 1e-5, jnp.float32),
        wk=jnp.full((F, D), 1e-5, jnp.float32),
        wv=jnp.full((F, D), 1e-5, jnp.float32),
        bq=jax.random.uniform(k4, (1, D), jnp.float32, -bound, bound),
        bk=jax.random.uniform(k5, (1, D), jnp.float32, -bound, bound),
        bv=jax.random.uniform(k6, (1, D), jnp.float32, -bound, bound),
    )
    # note: self.w_out (Linear(d_head, in_features)) and self.activation are
    # never used in forward(); omitted.

    # Small tiles here exercise multi-tile accumulation across the edge grid.
    attn, (v, prods) = sparse_graph_transformer_attention(
        x, edge, params, opt, edge_attr, tile_n=8, tile_e=8)
    jax.block_until_ready((attn, v, prods))

    ra, (rv, rp) = _reference(x, edge, params, opt, edge_attr)
    np.testing.assert_allclose(np.asarray(attn), np.asarray(ra), rtol=1e-3, atol=1e-3)
    np.testing.assert_allclose(np.asarray(v), np.asarray(rv), rtol=1e-3, atol=1e-3)
    np.testing.assert_allclose(np.asarray(prods), np.asarray(rp), rtol=1e-3, atol=1e-3)
    print("KERNEL_OK")
</pallas_src>

<mosaic_0001>
module attributes {stable_mosaic.version = 11 : i64} {
  func.func @_proj_kernel(%arg0: i32, %arg1: memref<8x32xf32, #tpu.memory_space<vmem>>, %arg2: memref<32x96xf32, #tpu.memory_space<vmem>>, %arg3: memref<1x96xf32, #tpu.memory_space<vmem>>, %arg4: memref<8x32xf32, #tpu.memory_space<vmem>>, %arg5: memref<8x32xf32, #tpu.memory_space<vmem>>, %arg6: memref<8x32xf32, #tpu.memory_space<vmem>>) attributes {dimension_semantics = [#tpu.dimension_semantics<parallel>], iteration_bounds = array<i64: 2>, scalar_prefetch = 0 : i64, scratch_operands = 0 : i64, tpu.core_type = #tpu.core_type<tc>, window_params = [{transform_indices = @transform_0, window_bounds = array<i64: 8, 32>}, {pipeline_mode = #tpu.pipeline_mode<synchronous>, transform_indices = @transform_1, window_bounds = array<i64: 32, 96>}, {pipeline_mode = #tpu.pipeline_mode<synchronous>, transform_indices = @transform_2, window_bounds = array<i64: 1, 96>}, {transform_indices = @transform_3, window_bounds = array<i64: 8, 32>}, {transform_indices = @transform_4, window_bounds = array<i64: 8, 32>}, {transform_indices = @transform_5, window_bounds = array<i64: 8, 32>}]} {
    %c0 = arith.constant 0 : index
    %c0_0 = arith.constant 0 : index
    %0 = vector.load %arg1[%c0, %c0_0] : memref<8x32xf32, #tpu.memory_space<vmem>>, vector<8x32xf32>
    %c0_1 = arith.constant 0 : index
    %c0_2 = arith.constant 0 : index
    %1 = vector.load %arg2[%c0_1, %c0_2] : memref<32x96xf32, #tpu.memory_space<vmem>>, vector<32x96xf32>
    %cst = arith.constant dense<0.000000e+00> : vector<8x96xf32>
    %2 = tpu.matmul %0, %1, %cst {dimension_numbers = #tpu.dot_dimension_numbers<[1], [0], [0], [1], [0, 0, 1, 1], [], []>} : vector<8x32xf32>, vector<32x96xf32>, vector<8x96xf32> -> vector<8x96xf32>
    %c0_3 = arith.constant 0 : index
    %c0_4 = arith.constant 0 : index
    %3 = vector.load %arg3[%c0_3, %c0_4] : memref<1x96xf32, #tpu.memory_space<vmem>>, vector<1x96xf32>
    %4 = vector.broadcast %3 : vector<1x96xf32> to vector<8x96xf32>
    %5 = arith.addf %2, %4 : vector<8x96xf32>
    %6 = vector.extract_strided_slice %5 {offsets = [0, 0], sizes = [8, 32], strides = [1, 1]} : vector<8x96xf32> to vector<8x32xf32>
    %c0_5 = arith.constant 0 : index
    %c0_6 = arith.constant 0 : index
    %7 = vector.load %arg4[%c0_5, %c0_6] : memref<8x32xf32, #tpu.memory_space<vmem>>, vector<8x32xf32>
    tpu.vector_store %arg4[%c0_5, %c0_6], %6 {strides = array<i32>} : memref<8x32xf32, #tpu.memory_space<vmem>>, vector<8x32xf32>,
    %8 = vector.extract_strided_slice %5 {offsets = [0, 32], sizes = [8, 32], strides = [1, 1]} : vector<8x96xf32> to vector<8x32xf32>
    %c0_7 = arith.constant 0 : index
    %c0_8 = arith.constant 0 : index
    %9 = vector.load %arg5[%c0_7, %c0_8] : memref<8x32xf32, #tpu.memory_space<vmem>>, vector<8x32xf32>
    tpu.vector_store %arg5[%c0_7, %c0_8], %8 {strides = array<i32>} : memref<8x32xf32, #tpu.memory_space<vmem>>, vector<8x32xf32>,
    %10 = vector.extract_strided_slice %5 {offsets = [0, 64], sizes = [8, 32], strides = [1, 1]} : vector<8x96xf32> to vector<8x32xf32>
    %c0_9 = arith.constant 0 : index
    %c0_10 = arith.constant 0 : index
    %11 = vector.load %arg6[%c0_9, %c0_10] : memref<8x32xf32, #tpu.memory_space<vmem>>, vector<8x32xf32>
    tpu.vector_store %arg6[%c0_9, %c0_10], %10 {strides = array<i32>} : memref<8x32xf32, #tpu.memory_space<vmem>>, vector<8x32xf32>,
    return
  }
  func.func @transform_0(%arg0: i32) -> (i32, i32) {
    %c0_i32 = arith.constant 0 : i32
    %c0_i32_0 = arith.constant 0 : i32
    return %arg0, %c0_i32 : i32, i32
  }
  func.func @transform_1(%arg0: i32) -> (i32, i32) {
    %c0_i32 = arith.constant 0 : i32
    %c0_i32_0 = arith.constant 0 : i32
    %c0_i32_1 = arith.constant 0 : i32
    return %c0_i32, %c0_i32_0 : i32, i32
  }
  func.func @transform_2(%arg0: i32) -> (i32, i32) {
    %c0_i32 = arith.constant 0 : i32
    %c0_i32_0 = arith.constant 0 : i32
    %c0_i32_1 = arith.constant 0 : i32
    return %c0_i32, %c0_i32_0 : i32, i32
  }
  func.func @transform_3(%arg0: i32) -> (i32, i32) {
    %c0_i32 = arith.constant 0 : i32
    %c0_i32_0 = arith.constant 0 : i32
    return %arg0, %c0_i32 : i32, i32
  }
  func.func @transform_4(%arg0: i32) -> (i32, i32) {
    %c0_i32 = arith.constant 0 : i32
    %c0_i32_0 = arith.constant 0 : i32
    return %arg0, %c0_i32 : i32, i32
  }
  func.func @transform_5(%arg0: i32) -> (i32, i32) {
    %c0_i32 = arith.constant 0 : i32
    %c0_i32_0 = arith.constant 0 : i32
    return %arg0, %c0_i32 : i32, i32
  }
}

</mosaic_0001>

<bundles_post_ra>
// kernel: tpu_custom_call.1
= control target key start
LH: loop header
LB: loop body
LE: loop exit
PB: predicated region body
PF: predicated region fallthrough
CT: control target
= control target key end

     0   :  { %11 = vsyncpa [#allocation3], 0  ;;  %s1289_s0 = inlined_call_operand.hbm [shape: f32[16,32], index: 0, kind: input, shape index: {}]   ;;  %s1290_s1 = inlined_call_operand.hbm [shape: f32[32,96], index: 1, kind: input, shape index: {}]   ;;  %s1291_s2 = inlined_call_operand.hbm [shape: f32[1,96], index: 2, kind: input, shape index: {}]   ;;  %s1292_s3 = inlined_call_operand.hbm [shape: f32[16,32], index: 3, kind: output, shape index: {0}]   ;;  %s1293_s4 = inlined_call_operand.hbm [shape: f32[16,32], index: 4, kind: output, shape index: {1}]   ;;  %s1294_s5 = inlined_call_operand.hbm [shape: f32[16,32], index: 5, kind: output, shape index: {2}]  }
   0x1   :  { %13 = vsyncpa [#allocation3 + $0x1], 0 }
   0x2   :  { %14 = vsyncpa [#allocation6], 0 }
   0x3   :  { %15 = vsyncpa [#allocation4], 0 }
   0x4   :  { %17 = vsyncpa [#allocation4 + $0x1], 0 }
   0x5   :  { %18 = vsyncpa [#allocation10], 0 }
   0x6   :  { %20 = vsyncpa [#allocation10 + $0x1], 0  ;;  %s972_s18 = smov 0   ;;  %s974_s19 = smov 0  }
   0x7   :  { %s976_s20 = smov 0   ;;  %s978_s21 = smov 0  }
   0x8 LB: > { %s993_s22 = sadd.s32 4294967295, %s927_s21   ;;  %s581_s23 = sadd.s32 4294967294, %s927_s21   ;;  %s927_s21 = sphi %s978_s21, %s1314_s21   ;;  %s923_s20 = sphi %s976_s20, %s1313_s20   ;;  %s919_s19 = sphi %s974_s19, %s1312_s19   ;;  %s915_s18 = sphi %s972_s18, %s1311_s18  }
   0x9   : > { %p46_p0 = scmp.ne.s32.totalorder %s919_s19, %s915_s18  ;;  %p1295_p1 = scmp.eq.s32.totalorder %s993_s22, 0 }
   0xa   : > { %p118_p3 = scmp.eq.s32.totalorder %s581_s23, 1  ;;  %p582_p5 = scmp.ge.s32.totalorder %s927_s21, 1 }
   0xb   : > { %p1004_p4 = por %p1295_p1, %p46_p0  ;;  %p177_p7 = scmp.lt.s32.totalorder %s927_s21, 3 }
   0xc   : > { %p1009_p6 = por %p118_p3, %p46_p0  ;;  %s929_s27 = smov [#allocation5]  }
   0xd   : > { %s1298_s24 = scalar_select %p1004_p4, 1, 0 }
   0xe   : > { %s1299_s25 = scalar_select %p1009_p6, 1, 0 }
   0xf   : > { %p1014_p8 = pnand %p582_p5, %p177_p7  ;;  %s189_s28 = sshll.u32 %s929_s27, 4  ;;  %s1018_s28 = int_to_ptr.vmem [resolvable:$true] %s189_s28 }
  0x10   : > { %s930_s30 = smov [#allocation7]   ;;  %s711_s9 = scalar_lea.hbm %s1290_s1, 512 }
  0x11   : > { %p643_p9 = pneg %p1014_p8  ;;  %s203_s6 = sshll.u32 %s930_s30, 4  ;;  %s1029_s6 = int_to_ptr.vmem [resolvable:$true] %s203_s6 }
  0x12   : > { %p712_p12 = scmp.ne.s32.totalorder %s1290_s1, %s711_s9  ;;  %p718_p5 = scmp.lt.u32.totalorder %s711_s9, %s1290_s1 }
  0x13   : > { %p1025_p11 = pnand %p643_p9, %p1295_p1 }
  0x15   : > { %p713_p13 = pneg %p1025_p11 }
  0x17   : > { %p714_p0 = pnand %p713_p13, %p712_p12 }
  0x19   : > { %p715_p3 = pneg %p714_p0 }
  0x1b   : > { %p720_p7 = pnand %p718_p5, %p715_p3 }
  0x1d   : > { %723 = shalt.err (!%p720_p7)
}
  0x1e   : > { %s724_s14 = scalar_lea.vmem %s1018_s28, 512  ;;  %p732_p2 = scmp.lt.s32.totalorder %s1018_s28, %s1018_s28 }
  0x1f   : > { %p725_p9 = scmp.ne.s32.totalorder %s1018_s28, %s724_s14  ;;  %p733_p12 = scmp.lt.s32.totalorder %s724_s14, %s724_s14 }
  0x21   : > { %p727_p10 = pnand %p725_p9, %p713_p13  ;;  %p734_p0 = por %p733_p12, %p732_p2 }
  0x23   : > { %p728_p1 = pneg %p727_p10 }
  0x25   : > { %p735_p6 = pnand %p734_p0, %p728_p1 }
  0x27   : > { %738 = shalt.err (!%p735_p6)
}
  0x28   : > { %s931_s15 = smov 128   ;;  %s932_s16 = smov 8  }
  0x29   : > { %646 = dma.hbm_to_vmem [thread:$0]  (!%p1025_p11), %s1290_s1, 512, %s1018_s28, [#allocation6], %s931_s15, %s931_s15, %s932_s16  }
  0x2a   : > { %s739_s8 = scalar_lea.hbm %s1291_s2, 16 }
  0x2b   : > { %p740_p2 = scmp.ne.s32.totalorder %s1291_s2, %s739_s8  ;;  %p746_p10 = scmp.lt.u32.totalorder %s739_s8, %s1291_s2 }
  0x2d   : > { %p742_p1 = pnand %p740_p2, %p713_p13 }
  0x2f   : > { %p743_p6 = pneg %p742_p1 }
  0x31   : > { %p748_p3 = pnand %p746_p10, %p743_p6 }
  0x33   : > { %751 = shalt.err (!%p748_p3)
}
  0x34   : > { %s752_s28 = scalar_lea.vmem %s1029_s6, 16  ;;  %s759_s13 = scalar_lea.vmem %s1029_s6, 32 }
  0x35   : > { %p753_p5 = scmp.ne.s32.totalorder %s1029_s6, %s752_s28  ;;  %p760_p12 = scmp.lt.s32.totalorder %s1029_s6, %s1029_s6 }
  0x36   : > { %p761_p0 = scmp.lt.s32.totalorder %s759_s13, %s752_s28 }
  0x37   : > { %p755_p7 = pnand %p753_p5, %p713_p13 }
  0x38   : > { %p762_p2 = por %p761_p0, %p760_p12 }
  0x39   : > { %p756_p9 = pneg %p755_p7 }
  0x3b   : > { %p763_p1 = pnand %p762_p2, %p756_p9 }
  0x3d   : > { %766 = shalt.err (!%p763_p1)
}
  0x3e   : > { %649 = dma.hbm_to_vmem [thread:$0]  (!%p1025_p11), %s1291_s2, 16, %s1029_s6, [#allocation6]  }
  0x3f   : > { %s1085_s16 = sadd.s32 1, %s927_s21   ;;  %s33_s29 = sadd.s32 1, %s923_s20 }
  0x40   : > { %s30_s17 = ssub.s32 %s927_s21, %s1085_s16  ;;  %p40_p13 = scmp.ne.s32.totalorder %s923_s20, %s919_s19 }
  0x41   : > { %p31_p6 = scmp.eq.s32.totalorder %s30_s17, 0  ;;  %p41_p10 = scmp.eq.s32.totalorder %s927_s21, 0 }
  0x42   : > { %p1302_p3 = scmp.eq.s32.totalorder %s993_s22, 1  ;;  %p666_p7 = scmp.lt.s32.totalorder %s927_s21, 2 }
  0x43   : > { %s1101_s30 = scalar_select %p31_p6, %s923_s20, %s33_s29  }
  0x44   : > { %p1095_p5 = por %p1302_p3, %p40_p13  ;;  %p42_p9 = por %p41_p10, %p40_p13 }
  0x45   : > { %s214_s7 = sand.u32 1, %s923_s20   ;;  %s587_s6 = sshll.u32 %s927_s21, 7 }
  0x46   : > { %s1303_s27 = scalar_select %p1095_p5, 1, 0 }
  0x47   : > { %s586_s8 = sshll.u32 %s214_s7, 3  ;;  %s1108_s11 = scalar_lea.hbm %s1289_s0, %s587_s6 }
  0x48   : > { %s218_s12 = scalar_lea.vmem [#allocation2], %s586_s8  ;;  %p1112_p11 = pnand %p666_p7, %p42_p9 }
  0x49   : > { %s225_s28 = sshll.u32 %s218_s12, 4  ;;  %s215_s14 = scalar_lea.sflag [#allocation3], %s214_s7  ;;  %s1110_s28 = int_to_ptr.vmem [resolvable:$true] %s225_s28 }
  0x4a   : > { %s767_s15 = scalar_lea.hbm %s1108_s11, 128  ;;  %p769_p0 = pneg %p1112_p11 }
  0x4b   : > { %p768_p12 = scmp.ne.s32.totalorder %s1108_s11, %s767_s15  ;;  %s772_s8 = scalar_lea.hbm %s1289_s0, 256 }
  0x4c   : > { %p773_p13 = scmp.lt.u32.totalorder %s1108_s11, %s1289_s0  ;;  %p774_p6 = scmp.lt.u32.totalorder %s772_s8, %s767_s15 }
  0x4d   : > { %p770_p2 = pnand %p769_p0, %p768_p12  ;;  %p776_p3 = scmp.lt.u32.totalorder %s767_s15, %s1108_s11 }
  0x4e   : > { %p775_p10 = por %p774_p6, %p773_p13 }
  0x4f   : > { %p771_p1 = pneg %p770_p2 }
  0x50   : > { %p777_p7 = por %p776_p3, %p775_p10 }
  0x52   : > { %p778_p9 = pnand %p777_p7, %p771_p1 }
  0x54   : > { %781 = shalt.err (!%p778_p9)
}
  0x55   : > { %s782_s7 = scalar_lea.vmem %s1110_s28, 128  ;;  %s933_s10 = smov [#allocation2]  }
  0x56   : > { %p783_p12 = scmp.ne.s32.totalorder %s1110_s28, %s782_s7  ;;  %s787_s12 = sshll.u32 %s933_s10, 4  ;;  %s788_s12 = int_to_ptr.vmem [resolvable:$false] %s787_s12 }
  0x57   : > { %s789_s29 = scalar_lea.vmem %s788_s12, 256  ;;  %p790_p4 = scmp.lt.s32.totalorder %s1110_s28, %s788_s12 }
  0x58   : > { %p785_p2 = pnand %p783_p12, %p769_p0  ;;  %p791_p13 = scmp.lt.s32.totalorder %s789_s29, %s782_s7 }
  0x5a   : > { %p786_p5 = pneg %p785_p2  ;;  %p792_p6 = por %p791_p13, %p790_p4 }
  0x5c   : > { %p793_p10 = pnand %p792_p6, %p786_p5 }
  0x5e   : > { %796 = shalt.err (!%p793_p10)
}
  0x5f   : > { %653 = dma.hbm_to_vmem [thread:$0]  (!%p1112_p11), %s1108_s11, 128, %s1110_s28, %s215_s14  }
  0x60   : > { %234 = sbr.rel (%p1014_p8) target bundleno = 483 (0x1e3), region = 32  ;;  %s1144_s15 = sand.u32 (!%p1014_p8), 1, %s919_s19  }
  0x61   : > { %s1147_s17 = sshll.u32 (!%p1014_p8), %s1144_s15, 3  ;;  %s237_s8 = scalar_lea.sflag (!%p1014_p8), [#allocation3], %s1144_s15 }
  0x62   : > { %s240_s6 = scalar_lea.vmem (!%p1014_p8), [#allocation2], %s1147_s17  ;;  %p1305_p4 = scmp.ne.s32.totalorder (!%p1014_p8), %s1298_s24, 0 }
  0x67   : > { %898 = dma.done.wait (%p1305_p4), %s237_s8, 128  }
  0x68   : > { %900 = vsyncadd (%p1305_p4), %s237_s8, 4294967168  ;;  %p1306_p5 = scmp.eq.s32.totalorder %s993_s22, 0 }
  0x6a   : > { %902 = dma.done.wait (%p1306_p5), [#allocation6], 528   ;;  %p1307_p8 = pmov %p1306_p5 }
  0x6b   : > { %v934_v0 = vmov 0.0|0.0   ;;  %vm935_vm0 = vmmov 0   ;;  %v936_v1 = vmov 0.0   ;;  %v286_v2 = vld [vmem:[#allocation5] sm:$0xff]  ;;  %v287_v3 = vld [vmem:[#allocation5 + $0x8] sm:$0xff]  ;;  %v288_v4 = vld [vmem:[#allocation5 + $0x10] sm:$0xff] }
  0x6c   : > { %904 = vsyncadd (%p1307_p8), [#allocation6], 4294966768  ;;  %621 = vmatprep.subr.bf16.mxu0 %v934_v0  ;;  %618 = vmatprep.mubr.msk.f32.mxu0 %vm935_vm0, %v936_v1  ;;  %v622_v5 = vpack.c.bf16 %v287_v3, %v286_v2  ;;  %v289_v6 = vld [vmem:[#allocation5 + $0x18] sm:$0xff]  ;;  %vm297_vm1 = vcmask 261120   ;;  %v595_v9 = vld [vmem:[#allocation7] ss:$0 sm:$0xff] }
  0x6d   : > { %v625_v7 = vpack.c.bf16 %v289_v6, %v288_v4  ;;  %v285_v8 = vld [vmem:[%s240_s6] sm:$0xff]  ;;  %s1161_s24 = sshll.u32 %s993_s22, 7  ;;  %s270_s26 = scalar_lea.vmem [#allocation8], %s1147_s17 }
  0x6e   : > { %623 = vmatpush3.bf16.msra.mxu0 %v622_v5  ;;  %s405_s11 = sshll.u32 %s270_s26, 4  ;;  %s1168_s14 = scalar_lea.hbm %s1292_s3, %s1161_s24  ;;  %s1170_s11 = int_to_ptr.vmem [resolvable:$true] %s405_s11 }
  0x6f   : > { %624 = vmatprep.subr.bf16.mxu0 %v934_v0  ;;  %s937_s9 = smov 96   ;;  %s382_s7 = scalar_lea.sflag [#allocation4], %s1144_s15 }
  0x70   : > { %s797_s10 = scalar_lea.vmem %s1170_s11, 128  ;;  %p1308_p0 = scmp.ne.s32.totalorder %s1303_s27, 0 }
  0x71   : > { %p798_p11 = scmp.ne.s32.totalorder %s1170_s11, %s797_s10  ;;  %s938_s12 = smov [#allocation8]  }
  0x72   : > { %626 = vmatpush3.bf16.msra.mxu0 %v625_v7  ;;  %s801_s29 = sshll.u32 %s938_s12, 4  ;;  %s802_s29 = int_to_ptr.vmem [resolvable:$false] %s801_s29 }
  0x73   : > { %p799_p1 = pnand %p798_p11, %p1308_p0  ;;  %s803_s8 = scalar_lea.vmem %s802_s29, 256 }
  0x74   : > { %p804_p7 = scmp.lt.s32.totalorder %s1170_s11, %s802_s29  ;;  %p805_p9 = scmp.lt.s32.totalorder %s803_s8, %s797_s10 }
  0x75   : > { %619 = vmatmul.mubr.msk.f32.vlgmr.msra.gmra.mrb[0].mxu0 %vm297_vm1, %v285_v8  ;;  %p800_p3 = pneg %p799_p1 }
  0x76   : > { %p806_p12 = por %p805_p9, %p804_p7 }
  0x78   : > { %p807_p2 = pnand %p806_p12, %p800_p3 }
 0x148   : > { %v367_v10 = vpop.f32.mrb[0].mxu0 }
 0x149   : > { %v368_v11 = vadd.f32 %v595_v9, %v367_v10  ;;  %v620_v12 = vpop.f32.mrb[1].mxu0 }
 0x14b   : > { %373 = vrot.lane.b32.xlu0 %v368_v11, %s937_s9  ;;  %371 = vst.msk [vmem:[%s270_s26] sm:$0xff] %vm297_vm1, %v368_v11 }
 0x14c   : > { %810 = shalt.err (!%p807_p2)
}
 0x14d   : > { %s811_s15 = scalar_lea.hbm %s1168_s14, 128  ;;  %s815_s28 = scalar_lea.hbm %s1292_s3, 256 }
 0x14e   : > { %p812_p13 = scmp.ne.s32.totalorder %s1168_s14, %s811_s15  ;;  %p816_p4 = scmp.lt.u32.totalorder %s1168_s14, %s1292_s3 }
 0x14f   : > { %p817_p5 = scmp.lt.u32.totalorder %s815_s28, %s811_s15  ;;  %p819_p11 = scmp.lt.u32.totalorder %s811_s15, %s1168_s14 }
 0x150   : > { %p813_p6 = pnand %p812_p13, %p1308_p0 }
 0x151   : > { %p818_p8 = por %p817_p5, %p816_p4 }
 0x152   : > { %p814_p10 = pneg %p813_p6 }
 0x153   : > { %p820_p1 = por %p819_p11, %p818_p8 }
 0x155   : > { %p821_p3 = pnand %p820_p1, %p814_p10 }
 0x157   : > { %824 = shalt.err (!%p821_p3)
}
 0x158   : > { %637 = dma.vmem_to_hbm [thread:$0]  (%p1308_p0), %s1170_s11, 128, %s1168_s14, %s382_s7  }
 0x159   : > { %s939_s10 = smov 64   ;;  %s386_s12 = sand.u32 1, %s993_s22  }
 0x15a   : > { %377 = vrot.lane.b32.xlu0 %v368_v11, %s939_s10  ;;  %s277_s29 = scalar_lea.vmem [#allocation9], %s1147_s17  ;;  %s1201_s26 = scalar_lea.hbm %s1293_s4, %s1161_s24 }
 0x15b   : > { %s418_s8 = sshll.u32 %s277_s29, 4  ;;  %s284_s28 = scalar_lea.vmem [#allocation11], %s1147_s17  ;;  %s1203_s8 = int_to_ptr.vmem [resolvable:$true] %s418_s8 }
 0x15c   : > { %s1208_s13 = sshll.u32 %s284_s28, 4  ;;  %s1211_s22 = scalar_lea.sflag [#allocation10], %s386_s12  ;;  %s1242_s13 = int_to_ptr.vmem [resolvable:$true] %s1208_s13 }
 0x15d   : > { %s825_s11 = scalar_lea.vmem %s1203_s8, 128  ;;  %s940_s14 = smov [#allocation9]  }
 0x15e   : > { %p826_p7 = scmp.ne.s32.totalorder %s1203_s8, %s825_s11  ;;  %s829_s7 = sshll.u32 %s940_s14, 4  ;;  %s830_s7 = int_to_ptr.vmem [resolvable:$false] %s829_s7 }
 0x15f   : > { %s831_s9 = scalar_lea.vmem %s830_s7, 256  ;;  %p832_p2 = scmp.lt.s32.totalorder %s1203_s8, %s830_s7 }
 0x160   : > { %p827_p9 = pnand %p826_p7, %p1308_p0  ;;  %p833_p13 = scmp.lt.s32.totalorder %s831_s9, %s825_s11 }
 0x162   : > { %p828_p12 = pneg %p827_p9  ;;  %p834_p6 = por %p833_p13, %p832_p2 }
 0x164   : > { %p835_p10 = pnand %p834_p6, %p828_p12 }
 0x1bd   : > { %v374_v13 = vpop.permute.xlu0 %373 }
 0x1be   : > { %376 = vst.msk [vmem:[%s277_s29] sm:$0xff] %vm297_vm1, %v374_v13 }
 0x1bf   : > { %838 = shalt.err (!%p835_p10)
}
 0x1c0   : > { %s839_s10 = scalar_lea.hbm %s1201_s26, 128  ;;  %s843_s15 = scalar_lea.hbm %s1293_s4, 256 }
 0x1c1   : > { %p840_p4 = scmp.ne.s32.totalorder %s1201_s26, %s839_s10  ;;  %p844_p11 = scmp.lt.u32.totalorder %s1201_s26, %s1293_s4 }
 0x1c2   : > { %p845_p1 = scmp.lt.u32.totalorder %s843_s15, %s839_s10  ;;  %p847_p7 = scmp.lt.u32.totalorder %s839_s10, %s1201_s26 }
 0x1c3   : > { %p841_p5 = pnand %p840_p4, %p1308_p0 }
 0x1c4   : > { %p846_p3 = por %p845_p1, %p844_p11 }
 0x1c5   : > { %p842_p8 = pneg %p841_p5 }
 0x1c6   : > { %p848_p9 = por %p847_p7, %p846_p3 }
 0x1c8   : > { %p849_p12 = pnand %p848_p9, %p842_p8 }
 0x1ca   : > { %852 = shalt.err (!%p849_p12)
}
 0x1cb   : > { %638 = dma.vmem_to_hbm [thread:$0]  (%p1308_p0), %s1203_s8, 128, %s1201_s26, %s1211_s22  }
 0x1cc   : > { %s1239_s9 = scalar_lea.hbm %s1294_s5, %s1161_s24  ;;  %v378_v14 = vpop.permute.xlu0 %377  ;;  %s853_s10 = scalar_lea.vmem %s1242_s13, 128 }
 0x1cd   : > { %380 = vst.msk [vmem:[%s284_s28] sm:$0xff] %vm297_vm1, %v378_v14  ;;  %p854_p2 = scmp.ne.s32.totalorder %s1242_s13, %s853_s10  ;;  %s941_s8 = smov [#allocation11]  }
 0x1ce   : > { %s857_s26 = sshll.u32 %s941_s8, 4  ;;  %s858_s26 = int_to_ptr.vmem [resolvable:$false] %s857_s26 }
 0x1cf   : > { %p855_p13 = pnand %p854_p2, %p1308_p0  ;;  %s859_s12 = scalar_lea.vmem %s858_s26, 256 }
 0x1d0   : > { %p860_p10 = scmp.lt.s32.totalorder %s1242_s13, %s858_s26  ;;  %p861_p4 = scmp.lt.s32.totalorder %s859_s12, %s853_s10 }
 0x1d1   : > { %p856_p6 = pneg %p855_p13 }
 0x1d2   : > { %p862_p5 = por %p861_p4, %p860_p10 }
 0x1d4   : > { %p863_p8 = pnand %p862_p5, %p856_p6 }
 0x1d6   : > { %866 = shalt.err (!%p863_p8)
}
 0x1d7   : > { %s867_s17 = scalar_lea.hbm %s1239_s9, 128  ;;  %s871_s29 = scalar_lea.hbm %s1294_s5, 256 }
 0x1d8   : > { %p868_p11 = scmp.ne.s32.totalorder %s1239_s9, %s867_s17  ;;  %p872_p7 = scmp.lt.u32.totalorder %s1239_s9, %s1294_s5 }
 0x1d9   : > { %p873_p9 = scmp.lt.u32.totalorder %s871_s29, %s867_s17  ;;  %p875_p2 = scmp.lt.u32.totalorder %s867_s17, %s1239_s9 }
 0x1da   : > { %p869_p1 = pnand %p868_p11, %p1308_p0 }
 0x1db   : > { %p874_p12 = por %p873_p9, %p872_p7 }
 0x1dc   : > { %p870_p3 = pneg %p869_p1 }
 0x1dd   : > { %p876_p13 = por %p875_p2, %p874_p12 }
 0x1df   : > { %p877_p6 = pnand %p876_p13, %p870_p3 }
 0x1e1   : > { %880 = shalt.err (!%p877_p6)
}
 0x1e2   : > { %639 = dma.vmem_to_hbm [thread:$0]  (%p1308_p0), %s1242_s13, 128, %s1239_s9, %s1211_s22  }
 0x1e3 PF: > { %s443_s14 = sand.u32 1, %s915_s18   ;;  %p1309_p10 = scmp.ne.s32.totalorder %s1299_s25, 0 }
 0x1e4   : > { %p1310_p4 = scmp.ge.s32.totalorder %s927_s21, 2  ;;  %s444_s11 = scalar_lea.sflag [#allocation4], %s443_s14 }
 0x1e6   : > { %p655_p5 = pnand %p1310_p4, %p1309_p10 }
 0x1e8   : > { %906 = dma.done.wait (!%p655_p5), %s444_s11, 128  }
 0x1e9   : > { %908 = vsyncadd (!%p655_p5), %s444_s11, 4294967168  ;;  %s452_s7 = sand.u32 1, %s581_s23  }
 0x1ea   : > { %s453_s10 = scalar_lea.sflag [#allocation10], %s452_s7 }
 0x1eb   : > { %910 = dma.done.wait (!%p655_p5), %s453_s10, 256  }
 0x1ec   : > { %912 = vsyncadd (!%p655_p5), %s453_s10, 4294967040  ;;  %p23_p0 = scmp.ge.s32.totalorder %s1085_s16, 4   ;;  %s1311_s18 = smov %s919_s19 }
 0x1ed   : > { %s1312_s19 = smov %s923_s20  ;;  %s1313_s20 = smov %s1101_s30 }
 0x1ee   : > { %s1314_s21 = smov %s1085_s16  ;;  %25 = sbr.rel (!%p23_p0) target bundleno = 8 (0x8), region = 117 }
 0x1f5   :  { %467 = vsyncpa [#allocation3], 1 }
 0x1f6   :  { %469 = vsyncpa [#allocation3 + $0x1], 1 }
 0x1f7   :  { %470 = vsyncpa [#allocation6], 1 }
 0x1f8   :  { %471 = vsyncpa [#allocation4], 1 }
 0x1f9   :  { %473 = vsyncpa [#allocation4 + $0x1], 1 }
 0x1fa   :  { %474 = vsyncpa [#allocation10], 1 }
 0x1fb   :  { %476 = vsyncpa [#allocation10 + $0x1], 1 }

</bundles_post_ra>
